<compile_context>
chip_gen: v5e
topology: v5e:2x2
jax: 0.10.0
libtpu: 0.0.40
codegen_flags: <defaults>
</compile_context>

<pallas_src>
import functools

import jax
import jax.numpy as jnp
from jax.experimental import pallas as pl
from jax.experimental.pallas import tpu as pltpu

LANE = 128   # vreg lane width
SUB = 8      # f32 sublanes per vreg


def _tpu_config():
    """Per-generation (max_block_rows, vmem_limit_bytes, num_cores)."""
    vmem = None
    cores = None
    try:
        info = pltpu.get_tpu_info()
        vmem = getattr(info, "vmem_capacity_bytes", None)
        for name in ("num_cores", "num_tensorcores", "tensor_core_count",
                     "core_count"):
            v = getattr(info, name, None)
            if isinstance(v, int) and v > 0:
                cores = v
                break
    except Exception:
        pass
    if vmem is None:
        vmem = 64 * 1024 * 1024  # conservative (v7x-sized) fallback
    if vmem >= 100 * 1024 * 1024:
        # v5e / v6e: 128 MiB physical VMEM -> 8 MiB f32 blocks, 48 MiB of
        # double-buffered inputs, explicit 64 MiB scoped limit.
        return 16384, 64 * 1024 * 1024, (cores if cores else 1)
    # v7x: 64 MiB per TensorCore -> 4 MiB blocks, stay well under budget.
    return 8192, 48 * 1024 * 1024, (cores if cores else 2)


def _dice_kernel(l_ref, t_ref, m_ref, inter_ref, union_ref, *,
                 block_rows, nblocks, blocks_per_split, valid_rows, need_mask):
    c = pl.program_id(0)            # core split (parallel axis)
    i = pl.program_id(1)            # tile loop within the split (arbitrary)
    blk = c * blocks_per_split + i

    @pl.when(i == 0)
    def _init():
        inter_ref[...] = jnp.zeros_like(inter_ref)
        union_ref[...] = jnp.zeros_like(union_ref)

    @pl.when(blk < nblocks)
    def _accum():
        m = m_ref[...].astype(jnp.float32)
        x = l_ref[...].astype(jnp.float32)
        # sigmoid(x) == 0.5 * tanh(0.5*x) + 0.5: one EUP push per element.
        p = (0.5 * jnp.tanh(0.5 * x) + 0.5) * m
        t = t_ref[...].astype(jnp.float32) * m
        inter = p * t
        u = p + t

        def _acc(iv, uv):
            # Vector-wise accumulation: (block_rows,128) -> (8,128) VPU adds.
            inter_ref[...] += iv.reshape(-1, SUB, LANE).sum(axis=0)[None]
            union_ref[...] += uv.reshape(-1, SUB, LANE).sum(axis=0)[None]

        if need_mask:
            is_last = blk == nblocks - 1

            @pl.when(is_last)
            def _masked():
                # Only the final (partial) block pays for iota/compare/select.
                # jnp.where (NOT arithmetic masking) so NaN/Inf in unspecified
                # out-of-bounds rows is discarded safely.
                row = jax.lax.broadcasted_iota(
                    jnp.int32, (block_rows, LANE), 0)
                valid = (blk * block_rows + row) < valid_rows
                _acc(jnp.where(valid, inter, 0.0), jnp.where(valid, u, 0.0))

            @pl.when(blk != nblocks - 1)
            def _full():
                _acc(inter, u)
        else:
            _acc(inter, u)


def masked_dice_loss(logits, targets, maskmats, eps=1e-8,
                     max_block_rows=None, force_nsplit=None):
    assert logits.shape == targets.shape == maskmats.shape

    total = int(logits.size)
    lf = logits.reshape(-1)
    tf = targets.reshape(-1)
    mf = maskmats.reshape(-1)

    rows = total // LANE
    bulk = rows * LANE
    use_kernel = rows >= SUB          # tiny inputs: plain JAX only
    if not use_kernel:
        bulk = 0

    inter_sum = jnp.float32(0.0)
    union_sum = jnp.float32(0.0)

    if use_kernel:
        dflt_rows, vmem_limit, ncores = _tpu_config()
        if max_block_rows is None:
            max_block_rows = dflt_rows
        if force_nsplit is not None:
            ncores = int(force_nsplit)

        block_rows = min(int(max_block_rows), rows)
        block_rows = max(SUB, (block_rows // SUB) * SUB)   # (8,128) constraint
        nblocks = -(-rows // block_rows)
        nsplit = ncores if nblocks >= ncores else 1
        bps = -(-nblocks // nsplit)                        # blocks per split
        need_mask = (rows % block_rows) != 0               # partial last block

        # Free reshape when total % 128 == 0; otherwise a prefix slice of the
        # lane-aligned bulk (no full pad copy, no write of padding).
        l2 = (lf if bulk == total else lf[:bulk]).reshape(rows, LANE)
        t2 = (tf if bulk == total else tf[:bulk]).reshape(rows, LANE)
        m2 = (mf if bulk == total else mf[:bulk]).reshape(rows, LANE)

        def in_map(c, i):
            return (jnp.minimum(c * bps + i, nblocks - 1), 0)

        out_map = lambda c, i: (c, 0, 0)

        kernel = functools.partial(
            _dice_kernel,
            block_rows=block_rows,
            nblocks=nblocks,
            blocks_per_split=bps,
            valid_rows=rows,
            need_mask=need_mask,
        )

        bytes_in = sum(int(a.size) * a.dtype.itemsize for a in (l2, t2, m2))

        inter_p, union_p = pl.pallas_call(
            kernel,
            out_shape=(
                jax.ShapeDtypeStruct((nsplit, SUB, LANE), jnp.float32),
                jax.ShapeDtypeStruct((nsplit, SUB, LANE), jnp.float32),
            ),
            grid_spec=pltpu.PrefetchScalarGridSpec(
                num_scalar_prefetch=0,
                grid=(nsplit, bps),
                in_specs=[
                    pl.BlockSpec((block_rows, LANE), in_map),
                    pl.BlockSpec((block_rows, LANE), in_map),
                    pl.BlockSpec((block_rows, LANE), in_map),
                ],
                out_specs=[
                    pl.BlockSpec((1, SUB, LANE), out_map),
                    pl.BlockSpec((1, SUB, LANE), out_map),
                ],
            ),
            compiler_params=pltpu.CompilerParams(
                dimension_semantics=("parallel", "arbitrary"),
                vmem_limit_bytes=vmem_limit,
            ),
            cost_estimate=pl.CostEstimate(
                flops=8 * bulk,
                transcendentals=bulk,
                bytes_accessed=bytes_in + 2 * nsplit * SUB * LANE * 4,
            ),
        )(l2, t2, m2)

        inter_sum = inter_sum + jnp.sum(inter_p)
        union_sum = union_sum + jnp.sum(union_p)

    if bulk != total:
        # Ragged tail (<128 elements when the kernel ran, <1024 for tiny
        # inputs): plain JAX, so the hot path reads each input exactly once.
        mt = mf[bulk:].astype(jnp.float32)
        pt = jax.nn.sigmoid(lf[bulk:].astype(jnp.float32)) * mt
        tt = tf[bulk:].astype(jnp.float32) * mt
        inter_sum = inter_sum + jnp.sum(pt * tt)
        union_sum = union_sum + jnp.sum(pt) + jnp.sum(tt)

    intersection = 2.0 * inter_sum
    return 1.0 - (intersection + eps) / (union_sum + eps)


def _reference(logits, targets, maskmats, eps=1e-8):
    num = logits.shape[0]
    p = jax.nn.sigmoid(logits.astype(jnp.float32)).reshape(num, -1)
    t = targets.astype(jnp.float32).reshape(num, -1)
    m = maskmats.astype(jnp.float32).reshape(num, -1)
    t = t * m
    p = p * m
    intersection = 2.0 * jnp.sum(p * t)
    union = jnp.sum(p) + jnp.sum(t)
    return 1.0 - (intersection + eps) / (union + eps)


if __name__ == "__main__":
    # Check 1: (b, c, z, y, x) small synthetic volume, single-block fast path.
    b, c, z, y, x = 2, 4, 4, 16, 16
    k1, k2, k3 = jax.random.split(jax.random.PRNGKey(0), 3)
    logits = jax.random.normal(k1, (b, c, z, y, x), dtype=jnp.float32)
    targets = jax.random.bernoulli(k2, 0.3, (b, c, z, y, x)).astype(jnp.float32)
    maskmats = jax.random.bernoulli(k3, 0.7, (b, c, z, y, x)).astype(jnp.float32)

    loss = jax.block_until_ready(masked_dice_loss(logits, targets, maskmats))
    ref = jax.block_until_ready(_reference(logits, targets, maskmats))
    assert loss.shape == ()
    assert jnp.allclose(loss, ref, rtol=1e-4, atol=1e-5), (loss, ref)

    # Check 2: narrow (bf16) targets/mask, multi-block grid with a partial
    # last block, forced 2-way core split with a gated dummy grid step.
    shp2 = (2, 4, 4, 16, 17)   # 8704 elems -> 68 rows of 128
    k4, k5, k6 = jax.random.split(jax.random.PRNGKey(1), 3)
    logits2 = jax.random.normal(k4, shp2, dtype=jnp.float32)
    targets2 = jax.random.bernoulli(k5, 0.4, shp2).astype(jnp.bfloat16)
    maskmats2 = jax.random.bernoulli(k6, 0.6, shp2).astype(jnp.bfloat16)

    loss2 = jax.block_until_ready(
        masked_dice_loss(logits2, targets2, maskmats2,
                         max_block_rows=24, force_nsplit=2))
    ref2 = jax.block_until_ready(_reference(logits2, targets2, maskmats2))
    assert jnp.allclose(loss2, ref2, rtol=1e-4, atol=1e-5), (loss2, ref2)

    # Check 3: ragged element count (lane-unaligned) -> kernel bulk + JAX tail.
    shp3 = (2, 3, 5, 7, 13)    # 2730 elems -> 21 rows of 128 + 42-elem tail
    k7, k8, k9 = jax.random.split(jax.random.PRNGKey(2), 3)
    logits3 = jax.random.normal(k7, shp3, dtype=jnp.float32)
    targets3 = jax.random.bernoulli(k8, 0.5, shp3).astype(jnp.bfloat16)
    maskmats3 = jax.random.bernoulli(k9, 0.5, shp3).astype(jnp.bfloat16)

    loss3 = jax.block_until_ready(
        masked_dice_loss(logits3, targets3, maskmats3, max_block_rows=16))
    ref3 = jax.block_until_ready(_reference(logits3, targets3, maskmats3))
    assert jnp.allclose(loss3, ref3, rtol=1e-4, atol=1e-5), (loss3, ref3)

    print("KERNEL_OK")
</pallas_src>

<mosaic_0001>
module attributes {stable_mosaic.version = 11 : i64} {
  func.func @_dice_kernel(%arg0: i32, %arg1: i32, %arg2: memref<64x128xf32, #tpu.memory_space<vmem>>, %arg3: memref<64x128xf32, #tpu.memory_space<vmem>>, %arg4: memref<64x128xf32, #tpu.memory_space<vmem>>, %arg5: memref<1x8x128xf32, #tpu.memory_space<vmem>>, %arg6: memref<1x8x128xf32, #tpu.memory_space<vmem>>) attributes {dimension_semantics = [#tpu.dimension_semantics<parallel>, #tpu.dimension_semantics<arbitrary>], iteration_bounds = array<i64: 1, 1>, scalar_prefetch = 0 : i64, scratch_operands = 0 : i64, tpu.core_type = #tpu.core_type<tc>, window_params = [{transform_indices = @transform_0, window_bounds = array<i64: 64, 128>}, {transform_indices = @transform_1, window_bounds = array<i64: 64, 128>}, {transform_indices = @transform_2, window_bounds = array<i64: 64, 128>}, {transform_indices = @transform_3, window_bounds = array<i64: 1, 8, 128>}, {transform_indices = @transform_4, window_bounds = array<i64: 1, 8, 128>}]} {
    %c1_i32 = arith.constant 1 : i32
    %0 = arith.muli %arg0, %c1_i32 : i32
    %1 = arith.addi %0, %arg1 : i32
    %c0_i32 = arith.constant 0 : i32
    %2 = arith.cmpi eq, %arg1, %c0_i32 : i32
    %3 = arith.extui %2 : i1 to i32
    %c0_i32_0 = arith.constant 0 : i32
    %4 = arith.cmpi ne, %3, %c0_i32_0 : i32
    scf.if %4 {
      %cst = arith.constant 0.000000e+00 : f32
      %8 = vector.broadcast %cst : f32 to vector<1x8x128xf32>
      %c0 = arith.constant 0 : index
      %c0_3 = arith.constant 0 : index
      %c0_4 = arith.constant 0 : index
      %9 = vector.load %arg5[%c0, %c0_3, %c0_4] : memref<1x8x128xf32, #tpu.memory_space<vmem>>, vector<1x8x128xf32>
      tpu.vector_store %arg5[%c0, %c0_3, %c0_4], %8 {strides = array<i32>} : memref<1x8x128xf32, #tpu.memory_space<vmem>>, vector<1x8x128xf32>,
      %cst_5 = arith.constant 0.000000e+00 : f32
      %10 = vector.broadcast %cst_5 : f32 to vector<1x8x128xf32>
      %c0_6 = arith.constant 0 : index
      %c0_7 = arith.constant 0 : index
      %c0_8 = arith.constant 0 : index
      %11 = vector.load %arg6[%c0_6, %c0_7, %c0_8] : memref<1x8x128xf32, #tpu.memory_space<vmem>>, vector<1x8x128xf32>
      tpu.vector_store %arg6[%c0_6, %c0_7, %c0_8], %10 {strides = array<i32>} : memref<1x8x128xf32, #tpu.memory_space<vmem>>, vector<1x8x128xf32>,
    } else {
    }
    %c1_i32_1 = arith.constant 1 : i32
    %5 = arith.cmpi slt, %1, %c1_i32_1 : i32
    %6 = arith.extui %5 : i1 to i32
    %c0_i32_2 = arith.constant 0 : i32
    %7 = arith.cmpi ne, %6, %c0_i32_2 : i32
    scf.if %7 {
      %c0 = arith.constant 0 : index
      %c0_3 = arith.constant 0 : index
      %8 = vector.load %arg4[%c0, %c0_3] : memref<64x128xf32, #tpu.memory_space<vmem>>, vector<64x128xf32>
      %c0_4 = arith.constant 0 : index
      %c0_5 = arith.constant 0 : index
      %9 = vector.load %arg2[%c0_4, %c0_5] : memref<64x128xf32, #tpu.memory_space<vmem>>, vector<64x128xf32>
      %cst = arith.constant 5.000000e-01 : f32
      %10 = vector.broadcast %cst : f32 to vector<64x128xf32>
      %11 = arith.mulf %10, %9 : vector<64x128xf32>
      %12 = math.tanh %11 : vector<64x128xf32>
      %cst_6 = arith.constant 5.000000e-01 : f32
      %13 = vector.broadcast %cst_6 : f32 to vector<64x128xf32>
      %14 = arith.mulf %13, %12 : vector<64x128xf32>
      %cst_7 = arith.constant 5.000000e-01 : f32
      %15 = vector.broadcast %cst_7 : f32 to vector<64x128xf32>
      %16 = arith.addf %14, %15 : vector<64x128xf32>
      %17 = arith.mulf %16, %8 : vector<64x128xf32>
      %c0_8 = arith.constant 0 : index
      %c0_9 = arith.constant 0 : index
      %18 = vector.load %arg3[%c0_8, %c0_9] : memref<64x128xf32, #tpu.memory_space<vmem>>, vector<64x128xf32>
      %19 = arith.mulf %18, %8 : vector<64x128xf32>
      %20 = arith.mulf %17, %19 : vector<64x128xf32>
      %21 = arith.addf %17, %19 : vector<64x128xf32>
      %c0_10 = arith.constant 0 : index
      %c0_11 = arith.constant 0 : index
      %c0_12 = arith.constant 0 : index
      %22 = vector.load %arg5[%c0_10, %c0_11, %c0_12] : memref<1x8x128xf32, #tpu.memory_space<vmem>>, vector<1x8x128xf32>
      %23 = vector.shape_cast %20 : vector<64x128xf32> to vector<8x8x128xf32>
      %cst_13 = arith.constant dense<0.000000e+00> : vector<8x128xf32>
      %24 = vector.multi_reduction <add>, %23, %cst_13 [0] : vector<8x8x128xf32> to vector<8x128xf32>
      %25 = vector.shape_cast %24 : vector<8x128xf32> to vector<1x8x128xf32>
      %26 = arith.addf %22, %25 : vector<1x8x128xf32>
      %c0_14 = arith.constant 0 : index
      %c0_15 = arith.constant 0 : index
      %c0_16 = arith.constant 0 : index
      %27 = vector.load %arg5[%c0_14, %c0_15, %c0_16] : memref<1x8x128xf32, #tpu.memory_space<vmem>>, vector<1x8x128xf32>
      tpu.vector_store %arg5[%c0_14, %c0_15, %c0_16], %26 {strides = array<i32>} : memref<1x8x128xf32, #tpu.memory_space<vmem>>, vector<1x8x128xf32>,
      %c0_17 = arith.constant 0 : index
      %c0_18 = arith.constant 0 : index
      %c0_19 = arith.constant 0 : index
      %28 = vector.load %arg6[%c0_17, %c0_18, %c0_19] : memref<1x8x128xf32, #tpu.memory_space<vmem>>, vector<1x8x128xf32>
      %29 = vector.shape_cast %21 : vector<64x128xf32> to vector<8x8x128xf32>
      %cst_20 = arith.constant dense<0.000000e+00> : vector<8x128xf32>
      %30 = vector.multi_reduction <add>, %29, %cst_20 [0] : vector<8x8x128xf32> to vector<8x128xf32>
      %31 = vector.shape_cast %30 : vector<8x128xf32> to vector<1x8x128xf32>
      %32 = arith.addf %28, %31 : vector<1x8x128xf32>
      %c0_21 = arith.constant 0 : index
      %c0_22 = arith.constant 0 : index
      %c0_23 = arith.constant 0 : index
      %33 = vector.load %arg6[%c0_21, %c0_22, %c0_23] : memref<1x8x128xf32, #tpu.memory_space<vmem>>, vector<1x8x128xf32>
      tpu.vector_store %arg6[%c0_21, %c0_22, %c0_23], %32 {strides = array<i32>} : memref<1x8x128xf32, #tpu.memory_space<vmem>>, vector<1x8x128xf32>,
    } else {
    }
    return
  }
  func.func @transform_0(%arg0: i32, %arg1: i32) -> (i32, i32) {
    %c1_i32 = arith.constant 1 : i32
    %0 = arith.muli %arg0, %c1_i32 : i32
    %1 = arith.addi %0, %arg1 : i32
    %c0_i32 = arith.constant 0 : i32
    %2 = arith.minsi %1, %c0_i32 : i32
    %c0_i32_0 = arith.constant 0 : i32
    %c0_i32_1 = arith.constant 0 : i32
    return %2, %c0_i32_0 : i32, i32
  }
  func.func @transform_1(%arg0: i32, %arg1: i32) -> (i32, i32) {
    %c1_i32 = arith.constant 1 : i32
    %0 = arith.muli %arg0, %c1_i32 : i32
    %1 = arith.addi %0, %arg1 : i32
    %c0_i32 = arith.constant 0 : i32
    %2 = arith.minsi %1, %c0_i32 : i32
    %c0_i32_0 = arith.constant 0 : i32
    %c0_i32_1 = arith.constant 0 : i32
    return %2, %c0_i32_0 : i32, i32
  }
  func.func @transform_2(%arg0: i32, %arg1: i32) -> (i32, i32) {
    %c1_i32 = arith.constant 1 : i32
    %0 = arith.muli %arg0, %c1_i32 : i32
    %1 = arith.addi %0, %arg1 : i32
    %c0_i32 = arith.constant 0 : i32
    %2 = arith.minsi %1, %c0_i32 : i32
    %c0_i32_0 = arith.constant 0 : i32
    %c0_i32_1 = arith.constant 0 : i32
    return %2, %c0_i32_0 : i32, i32
  }
  func.func @transform_3(%arg0: i32, %arg1: i32) -> (i32, i32, i32) {
    %c0_i32 = arith.constant 0 : i32
    %c0_i32_0 = arith.constant 0 : i32
    %c0_i32_1 = arith.constant 0 : i32
    return %arg0, %c0_i32, %c0_i32_0 : i32, i32, i32
  }
  func.func @transform_4(%arg0: i32, %arg1: i32) -> (i32, i32, i32) {
    %c0_i32 = arith.constant 0 : i32
    %c0_i32_0 = arith.constant 0 : i32
    %c0_i32_1 = arith.constant 0 : i32
    return %arg0, %c0_i32, %c0_i32_0 : i32, i32, i32
  }
}

</mosaic_0001>

<bundles_post_ra>
// kernel: tpu_custom_call.1
= control target key start
LH: loop header
LB: loop body
LE: loop exit
PB: predicated region body
PF: predicated region fallthrough
CT: control target
= control target key end

     0   :  { %10 = vsyncpa [#allocation3], 0  ;;  %s453_s0 = inlined_call_operand.hbm [shape: f32[64,128], index: 0, kind: input, shape index: {}]   ;;  %s454_s1 = inlined_call_operand.hbm [shape: f32[64,128], index: 1, kind: input, shape index: {}]   ;;  %s455_s2 = inlined_call_operand.hbm [shape: f32[64,128], index: 2, kind: input, shape index: {}]   ;;  %s456_s3 = inlined_call_operand.hbm [shape: f32[1,8,128], index: 3, kind: output, shape index: {0}]   ;;  %s457_s4 = inlined_call_operand.hbm [shape: f32[1,8,128], index: 4, kind: output, shape index: {1}]  }
   0x1   :  { %11 = vsyncpa [#allocation6], 0 }
   0x2   :  { %12 = vsyncpa [#allocation4], 0 }
   0x3   :  { %13 = vsyncpa [#allocation10], 0  ;;  %s43_s17 = sshll.u32 %s454_s1, 4  ;;  %s406_s18 = smov [#allocation5]   ;;  %s44_s17 = int_to_ptr.hbm [resolvable:$true] %s43_s17 }
   0x4   :  { %s45_s19 = sshll.u32 %s406_s18, 4  ;;  %s24_s22 = sshll.u32 %s453_s0, 4  ;;  %s46_s19 = int_to_ptr.vmem [resolvable:$true] %s45_s19  ;;  %s25_s22 = int_to_ptr.hbm [resolvable:$true] %s24_s22 }
   0x5   :  { %s407_s23 = smov 128   ;;  %s408_s24 = smov 8  }
   0x6   :  { %51 = dma.hbm_to_vmem [thread:$0]  %s44_s17, 1024, %s46_s19, [#allocation6], %s407_s23, %s407_s23, %s408_s24  }
   0x7   :  { %s409_s25 = smov [#allocation2]   ;;  %s62_s29 = sshll.u32 %s455_s2, 4  ;;  %s63_s29 = int_to_ptr.hbm [resolvable:$true] %s62_s29 }
   0x8   :  { %s26_s26 = sshll.u32 %s409_s25, 4  ;;  %s410_s1 = smov [#allocation7]   ;;  %s27_s26 = int_to_ptr.vmem [resolvable:$true] %s26_s26 }
   0x9   :  { %32 = dma.hbm_to_vmem [thread:$0]  %s25_s22, 1024, %s27_s26, [#allocation3], %s407_s23, %s407_s23, %s408_s24  }
   0xa   :  { %s64_s30 = sshll.u32 %s410_s1, 4  ;;  %s65_s30 = int_to_ptr.vmem [resolvable:$true] %s64_s30 }
   0xb   :  { %70 = dma.hbm_to_vmem [thread:$0]  %s63_s29, 1024, %s65_s30, [#allocation6], %s407_s23, %s407_s23, %s408_s24  }
   0xc   :  { %398 = dma.done.wait [#allocation3], 1024  }
   0xd   :  { %399 = vsyncadd [#allocation3], 4294966272 }
   0xe   :  { %400 = dma.done.wait [#allocation6], 2048  }
   0xf   :  { %401 = vsyncadd [#allocation6], 4294965248  ;;  %v114_v0 = vld [vmem:[#allocation2] sm:$0xff]  ;;  %v115_v1 = vld [vmem:[#allocation2 + $0x8] sm:$0xff]  ;;  %s411_s0 = smov [#allocation8]   ;;  %s221_s7 = sshll.u32 %s456_s3, 4  ;;  %s222_s7 = int_to_ptr.hbm [resolvable:$true] %s221_s7 }
  0x10   :  { %v116_v2 = vld [vmem:[#allocation2 + $0x10] sm:$0xff]  ;;  %v117_v3 = vld [vmem:[#allocation2 + $0x18] sm:$0xff]  ;;  %v122_v4 = vmul.f32 0.5, %v114_v0  ;;  %v118_v5 = vld [vmem:[#allocation2 + $0x20] sm:$0xff]  ;;  %v123_v8 = vmul.f32 0.5, %v115_v1  ;;  %s219_s2 = sshll.u32 %s411_s0, 4  ;;  %s220_s2 = int_to_ptr.vmem [resolvable:$true] %s219_s2 }
  0x11   :  { %v119_v6 = vld [vmem:[#allocation2 + $0x28] sm:$0xff]  ;;  %v120_v7 = vld [vmem:[#allocation2 + $0x30] sm:$0xff]  ;;  %v124_v9 = vmul.f32 0.5, %v116_v2  ;;  %v125_v10 = vmul.f32 0.5, %v117_v3  ;;  %v121_v11 = vld [vmem:[#allocation2 + $0x38] sm:$0xff]  ;;  %v126_v12 = vmul.f32 0.5, %v118_v5 }
  0x12   :  { %262 = vtanh.f32 %v122_v4  ;;  %v127_v13 = vmul.f32 0.5, %v119_v6  ;;  %v128_v14 = vmul.f32 0.5, %v120_v7  ;;  %v129_v15 = vmul.f32 0.5, %v121_v11  ;;  %v106_v16 = vld [vmem:[#allocation7] sm:$0xff]  ;;  %v107_v17 = vld [vmem:[#allocation7 + $0x8] sm:$0xff]  ;;  %v108_v19 = vld [vmem:[#allocation7 + $0x10] sm:$0xff] }
  0x13   :  { %264 = vtanh.f32 %v123_v8  ;;  %v162_v20 = vld [vmem:[#allocation5] sm:$0xff]  ;;  %v163_v21 = vld [vmem:[#allocation5 + $0x8] sm:$0xff]  ;;  %v109_v23 = vld [vmem:[#allocation7 + $0x18] sm:$0xff]  ;;  %s412_s8 = smov [#allocation9]   ;;  %s232_s12 = sshll.u32 %s457_s4, 4  ;;  %s233_s12 = int_to_ptr.hbm [resolvable:$true] %s232_s12 }
  0x14   :  { %266 = vtanh.f32 %v124_v9  ;;  %v164_v25 = vld [vmem:[#allocation5 + $0x10] sm:$0xff]  ;;  %v165_v26 = vld [vmem:[#allocation5 + $0x18] sm:$0xff]  ;;  %v110_v28 = vld [vmem:[#allocation7 + $0x20] sm:$0xff]  ;;  %v170_v36 = vmul.f32 %v162_v20, %v106_v16  ;;  %v171_v37 = vmul.f32 %v163_v21, %v107_v17  ;;  %s230_s9 = sshll.u32 %s412_s8, 4  ;;  %s231_s9 = int_to_ptr.vmem [resolvable:$true] %s230_s9 }
  0x15   :  { %268 = vtanh.f32 %v125_v10  ;;  %v166_v30 = vld [vmem:[#allocation5 + $0x20] sm:$0xff]  ;;  %v111_v32 = vld [vmem:[#allocation7 + $0x28] sm:$0xff]  ;;  %v172_v41 = vmul.f32 %v164_v25, %v108_v19  ;;  %v173_v42 = vmul.f32 %v165_v26, %v109_v23  ;;  %v112_v58 = vld [vmem:[#allocation7 + $0x30] sm:$0xff] }
  0x16   :  { %270 = vtanh.f32 %v126_v12  ;;  %v167_v35 = vld [vmem:[#allocation5 + $0x28] sm:$0xff]  ;;  %v174_v47 = vmul.f32 %v166_v30, %v110_v28  ;;  %v168_v62 = vld [vmem:[#allocation5 + $0x30] sm:$0xff]  ;;  %v113_v4 = vld [vmem:[#allocation7 + $0x38] sm:$0xff] }
  0x17   :  { %272 = vtanh.f32 %v127_v13  ;;  %v175_v52 = vmul.f32 %v167_v35, %v111_v32  ;;  %v169_v7 = vld [vmem:[#allocation5 + $0x38] sm:$0xff]  ;;  %v176_v10 = vmul.f32 %v168_v62, %v112_v58 }
  0x18   :  { %v263_v18 = vpop.eup %262  ;;  %274 = vtanh.f32 %v128_v14 }
  0x19   :  { %v265_v22 = vpop.eup %264  ;;  %276 = vtanh.f32 %v129_v15  ;;  %v138_v24 = vmul.f32 0.5, %v263_v18 }
  0x1a   :  { %v267_v27 = vpop.eup %266  ;;  %v139_v29 = vmul.f32 0.5, %v265_v22 }
  0x1b   :  { %v269_v31 = vpop.eup %268  ;;  %v140_v33 = vmul.f32 0.5, %v267_v27  ;;  %v146_v34 = vadd.f32 0.5, %v138_v24 }
  0x1c   :  { %v271_v38 = vpop.eup %270  ;;  %v141_v39 = vmul.f32 0.5, %v269_v31  ;;  %v147_v40 = vadd.f32 0.5, %v139_v29 }
  0x1d   :  { %v273_v43 = vpop.eup %272  ;;  %v142_v44 = vmul.f32 0.5, %v271_v38  ;;  %v148_v45 = vadd.f32 0.5, %v140_v33  ;;  %v154_v46 = vmul.f32 %v146_v34, %v106_v16 }
  0x1e   :  { %v275_v48 = vpop.eup %274  ;;  %v143_v49 = vmul.f32 0.5, %v273_v43  ;;  %v149_v50 = vadd.f32 0.5, %v141_v39  ;;  %v155_v51 = vmul.f32 %v147_v40, %v107_v17  ;;  %v177_v17 = vmul.f32 %v169_v7, %v113_v4 }
  0x1f   :  { %v277_v53 = vpop.eup %276  ;;  %v144_v54 = vmul.f32 0.5, %v275_v48  ;;  %v150_v55 = vadd.f32 0.5, %v142_v44  ;;  %v156_v56 = vmul.f32 %v148_v45, %v108_v19  ;;  %v178_v57 = vmul.f32 %v170_v36, %v154_v46 }
  0x20   :  { %v145_v59 = vmul.f32 0.5, %v277_v53  ;;  %v151_v60 = vadd.f32 0.5, %v143_v49  ;;  %v157_v61 = vmul.f32 %v149_v50, %v109_v23  ;;  %v179_v63 = vmul.f32 %v171_v37, %v155_v51 }
  0x21   :  { %v152_v0 = vadd.f32 0.5, %v144_v54  ;;  %v158_v1 = vmul.f32 %v150_v55, %v110_v28  ;;  %v180_v2 = vmul.f32 %v172_v41, %v156_v56  ;;  %v186_v3 = vadd.f32 %v170_v36, %v154_v46 }
  0x22   :  { %v153_v5 = vadd.f32 0.5, %v145_v59  ;;  %v159_v6 = vmul.f32 %v151_v60, %v111_v32  ;;  %v181_v8 = vmul.f32 %v173_v42, %v157_v61  ;;  %v195_v9 = vadd.f32 %v179_v63, %v178_v57 }
  0x23   :  { %v187_v11 = vadd.f32 %v171_v37, %v155_v51  ;;  %v160_v12 = vmul.f32 %v152_v0, %v112_v58  ;;  %v182_v13 = vmul.f32 %v174_v47, %v158_v1  ;;  %v188_v15 = vadd.f32 %v172_v41, %v156_v56 }
  0x24   :  { %v196_v14 = vadd.f32 %v195_v9, %v180_v2  ;;  %v161_v16 = vmul.f32 %v153_v5, %v113_v4  ;;  %v183_v18 = vmul.f32 %v175_v52, %v159_v6  ;;  %v189_v20 = vadd.f32 %v173_v42, %v157_v61 }
  0x25   :  { %v205_v21 = vadd.f32 %v187_v11, %v186_v3  ;;  %v184_v22 = vmul.f32 %v176_v10, %v160_v12  ;;  %v190_v24 = vadd.f32 %v174_v47, %v158_v1  ;;  %v191_v28 = vadd.f32 %v175_v52, %v159_v6 }
  0x26   :  { %v197_v19 = vadd.f32 %v196_v14, %v181_v8  ;;  %v185_v26 = vmul.f32 %v177_v17, %v161_v16  ;;  %v192_v31 = vadd.f32 %v176_v10, %v160_v12  ;;  %v193_v34 = vadd.f32 %v177_v17, %v161_v16 }
  0x27   :  { %v206_v25 = vadd.f32 %v205_v21, %v188_v15 }
  0x28   :  { %v198_v23 = vadd.f32 %v197_v19, %v182_v13 }
  0x29   :  { %v207_v29 = vadd.f32 %v206_v25, %v189_v20 }
  0x2a   :  { %v199_v27 = vadd.f32 %v198_v23, %v183_v18 }
  0x2b   :  { %v208_v32 = vadd.f32 %v207_v29, %v190_v24 }
  0x2c   :  { %v200_v30 = vadd.f32 %v199_v27, %v184_v22 }
  0x2d   :  { %v209_v35 = vadd.f32 %v208_v32, %v191_v28 }
  0x2e   :  { %v201_v33 = vadd.f32 %v200_v30, %v185_v26 }
  0x2f   :  { %v210_v36 = vadd.f32 %v209_v35, %v192_v31 }
  0x30   :  { %203 = vst [vmem:[#allocation8] sm:$0xff] %v201_v33 }
  0x31   :  { %v211_v37 = vadd.f32 %v210_v36, %v193_v34  ;;  %224 = dma.vmem_to_hbm [thread:$0]  %s220_s2, 128, %s222_s7, [#allocation4]  }
  0x33   :  { %213 = vst [vmem:[#allocation9] sm:$0xff] %v211_v37 }
  0x34   :  { %235 = dma.vmem_to_hbm [thread:$0]  %s231_s9, 128, %s233_s12, [#allocation10]  }
  0x35   :  { %402 = dma.done.wait [#allocation4], 128  }
  0x36   :  { %403 = vsyncadd [#allocation4], 4294967168 }
  0x37   :  { %404 = dma.done.wait [#allocation10], 128  }
  0x38   :  { %405 = vsyncadd [#allocation10], 4294967168 }
  0x39   :  { %244 = vsyncpa [#allocation3], 1 }
  0x3a   :  { %245 = vsyncpa [#allocation6], 1 }
  0x3b   :  { %246 = vsyncpa [#allocation4], 1 }
  0x3c   :  { %247 = vsyncpa [#allocation10], 1 }

</bundles_post_ra>
